<compile_context>
chip_gen: v6e
topology: v6e:2x2x1
jax: 0.10.0
libtpu: 0.0.40
codegen_flags: <defaults>
</compile_context>

<pallas_src>
import math

import jax
import jax.numpy as jnp
from jax.experimental import pallas as pl
from jax.experimental.pallas import tpu as pltpu


def _round_up(x, m):
    return ((x + m - 1) // m) * m


# ----------------------------------------------------------------------------
# Pallas kernel: single collapsed linear layer  (u @ Wc + bc).
# ----------------------------------------------------------------------------
def _classifier_kernel(u_ref, wc_ref, bc_ref, o_ref):
    # [TB, D] bf16  @  [D, Cp] bf16  ->  f32 accumulation on the MXU.
    acc = jnp.dot(u_ref[...], wc_ref[...], preferred_element_type=jnp.float32)
    # Bias add stays in f32 on the VPU; output is a lane-dense f32 slab.
    o_ref[...] = acc + bc_ref[...]


def classification_head(u, wc_bf16, bc_f32, n_classes, *, block_b=256):
    """Fused classifier forward: (u @ W1 + b1) @ W2 + b2 via collapsed weights.

    u       : [B, D]    f32 encoder output
    wc_bf16 : [D, Cp]   bf16, Cp = n_classes padded to a multiple of 128
    bc_f32  : [1, Cp]   f32
    returns : [B, n_classes] f32
    """
    B, D = u.shape
    Dw, Cp = wc_bf16.shape
    assert Dw == D and bc_f32.shape == (1, Cp)

    # Batch tile: sublane-multiple (16 for bf16), capped at block_b rows.
    tb = min(block_b, _round_up(B, 16))
    Bp = _round_up(B, tb)

    u_p = u if Bp == B else jnp.pad(u, ((0, Bp - B), (0, 0)))
    u_p = u_p.astype(jnp.bfloat16)

    out = pl.pallas_call(
        _classifier_kernel,
        out_shape=jax.ShapeDtypeStruct((Bp, Cp), jnp.float32),
        grid_spec=pltpu.PrefetchScalarGridSpec(
            num_scalar_prefetch=0,
            grid=(Bp // tb,),
            in_specs=[
                # Activations: tiled over the batch grid (double-buffered DMA).
                pl.BlockSpec((tb, D), lambda i: (i, 0)),
                # Collapsed weight / bias: constant index_map -> VMEM-resident.
                pl.BlockSpec((D, Cp), lambda i: (0, 0)),
                pl.BlockSpec((1, Cp), lambda i: (0, 0)),
            ],
            out_specs=pl.BlockSpec((tb, Cp), lambda i: (i, 0)),
        ),
        compiler_params=pltpu.CompilerParams(
            dimension_semantics=("parallel",)),
    )(u_p, wc_bf16, bc_f32)

    return out[:B, :n_classes]


# ----------------------------------------------------------------------------
# Deterministic parameter init (matches PyTorch Linear default: U(-k, k),
# k = 1/sqrt(fan_in)); no checkpoint loading.
# ----------------------------------------------------------------------------
def init_linear(key, fan_in, fan_out):
    kw, kb = jax.random.split(key)
    k = 1.0 / math.sqrt(fan_in)
    # Stored as [in, out] (i.e. W.T relative to PyTorch's [out, in]).
    w = jax.random.uniform(kw, (fan_in, fan_out), jnp.float32, -k, k)
    b = jax.random.uniform(kb, (1, fan_out), jnp.float32, -k, k)
    return w, b


class ClassificationNetPallas:
    """JAX/Pallas counterpart of ClassificationNet's classifier forward."""

    def __init__(self, config, key):
        self.enc_lstm_dim = config["enc_lstm_dim"]
        self.n_classes = config["n_classes"]
        self.encoder_type = config["encoder_type"]
        # Same inputdim logic as the PyTorch module.
        inputdim = 2 * self.enc_lstm_dim
        inputdim = 4 * inputdim if self.encoder_type == "ConvNetEncoder" else inputdim
        inputdim = self.enc_lstm_dim if self.encoder_type == "LSTMEncoder" else inputdim
        self.inputdim = inputdim

        k1, k2 = jax.random.split(key)
        # Canonical (PyTorch-equivalent) parameters, kept in f32.
        self.w1, self.b1 = init_linear(k1, self.inputdim, 512)
        self.w2, self.b2 = init_linear(k2, 512, self.n_classes)

        # Collapse the activation-free two-layer stack on the host, in f32.
        wc = self.w1 @ self.w2                      # [D, C]
        bc = self.b1 @ self.w2 + self.b2            # [1, C]

        # Pad the class dimension to a lane-dense multiple of 128.
        c_pad = _round_up(self.n_classes, 128)
        pad_c = c_pad - self.n_classes
        wc = jnp.pad(wc, ((0, 0), (0, pad_c)))
        bc = jnp.pad(bc, ((0, 0), (0, pad_c)))

        self.wc_bf16 = wc.astype(jnp.bfloat16)      # MXU operand
        self.bc_f32 = bc.astype(jnp.float32)        # f32 bias add

    def forward(self, u):
        # `u` is the encoder output [B, inputdim]; the encoder itself is external.
        return classification_head(u, self.wc_bf16, self.bc_f32, self.n_classes)


if __name__ == "__main__":
    config = {
        "nonlinear_fc": 0,
        "fc_dim": 512,
        "n_classes": 3,
        "enc_lstm_dim": 32,                  # -> inputdim = 2 * 32 = 64
        "encoder_type": "InferSentEncoder",  # anything not ConvNet/LSTM special cases
        "dpout_fc": 0.0,
    }

    key = jax.random.PRNGKey(0)
    k_params, k_input = jax.random.split(key)

    net = ClassificationNetPallas(config, k_params)

    batch = 2
    u = jax.random.normal(k_input, (batch, net.inputdim), jnp.float32)

    out = net.forward(u)
    out = jax.block_until_ready(out)
    assert out.shape == (batch, config["n_classes"])

    # Reference 1: exact kernel math (bf16-cast collapsed weights, f32 accum).
    ref_kernel = (u.astype(jnp.bfloat16).astype(jnp.float32)
                  @ net.wc_bf16.astype(jnp.float32)[:, : net.n_classes]
                  + net.bc_f32[:, : net.n_classes])
    assert jnp.allclose(out, ref_kernel, atol=1e-3, rtol=1e-3)

    # Reference 2: original two-layer f32 forward (semantic check, looser tol
    # to account for bf16 MXU operands).
    ref_f32 = (u @ net.w1 + net.b1) @ net.w2 + net.b2
    assert jnp.allclose(out, ref_f32, atol=3e-2, rtol=3e-2)

    print("KERNEL_OK")
</pallas_src>

<mosaic_0001>
module attributes {stable_mosaic.version = 11 : i64} {
  func.func @_classifier_kernel(%arg0: i32, %arg1: memref<16x64xbf16, #tpu.memory_space<vmem>>, %arg2: memref<64x128xbf16, #tpu.memory_space<vmem>>, %arg3: memref<1x128xf32, #tpu.memory_space<vmem>>, %arg4: memref<16x128xf32, #tpu.memory_space<vmem>>) attributes {dimension_semantics = [#tpu.dimension_semantics<parallel>], iteration_bounds = array<i64: 1>, scalar_prefetch = 0 : i64, scratch_operands = 0 : i64, tpu.core_type = #tpu.core_type<tc>, window_params = [{transform_indices = @transform_0, window_bounds = array<i64: 16, 64>}, {pipeline_mode = #tpu.pipeline_mode<synchronous>, transform_indices = @transform_1, window_bounds = array<i64: 64, 128>}, {pipeline_mode = #tpu.pipeline_mode<synchronous>, transform_indices = @transform_2, window_bounds = array<i64: 1, 128>}, {transform_indices = @transform_3, window_bounds = array<i64: 16, 128>}]} {
    %c0 = arith.constant 0 : index
    %c0_0 = arith.constant 0 : index
    %0 = vector.load %arg1[%c0, %c0_0] : memref<16x64xbf16, #tpu.memory_space<vmem>>, vector<16x64xbf16>
    %c0_1 = arith.constant 0 : index
    %c0_2 = arith.constant 0 : index
    %1 = vector.load %arg2[%c0_1, %c0_2] : memref<64x128xbf16, #tpu.memory_space<vmem>>, vector<64x128xbf16>
    %cst = arith.constant dense<0.000000e+00> : vector<16x128xf32>
    %2 = tpu.matmul %0, %1, %cst {dimension_numbers = #tpu.dot_dimension_numbers<[1], [0], [0], [1], [0, 0, 1, 1], [], []>} : vector<16x64xbf16>, vector<64x128xbf16>, vector<16x128xf32> -> vector<16x128xf32>
    %c0_3 = arith.constant 0 : index
    %c0_4 = arith.constant 0 : index
    %3 = vector.load %arg3[%c0_3, %c0_4] : memref<1x128xf32, #tpu.memory_space<vmem>>, vector<1x128xf32>
    %4 = vector.broadcast %3 : vector<1x128xf32> to vector<16x128xf32>
    %5 = arith.addf %2, %4 : vector<16x128xf32>
    %c0_5 = arith.constant 0 : index
    %c0_6 = arith.constant 0 : index
    %6 = vector.load %arg4[%c0_5, %c0_6] : memref<16x128xf32, #tpu.memory_space<vmem>>, vector<16x128xf32>
    tpu.vector_store %arg4[%c0_5, %c0_6], %5 {strides = array<i32>} : memref<16x128xf32, #tpu.memory_space<vmem>>, vector<16x128xf32>,
    return
  }
  func.func @transform_0(%arg0: i32) -> (i32, i32) {
    %c0_i32 = arith.constant 0 : i32
    %c0_i32_0 = arith.constant 0 : i32
    return %arg0, %c0_i32 : i32, i32
  }
  func.func @transform_1(%arg0: i32) -> (i32, i32) {
    %c0_i32 = arith.constant 0 : i32
    %c0_i32_0 = arith.constant 0 : i32
    %c0_i32_1 = arith.constant 0 : i32
    return %c0_i32, %c0_i32_0 : i32, i32
  }
  func.func @transform_2(%arg0: i32) -> (i32, i32) {
    %c0_i32 = arith.constant 0 : i32
    %c0_i32_0 = arith.constant 0 : i32
    %c0_i32_1 = arith.constant 0 : i32
    return %c0_i32, %c0_i32_0 : i32, i32
  }
  func.func @transform_3(%arg0: i32) -> (i32, i32) {
    %c0_i32 = arith.constant 0 : i32
    %c0_i32_0 = arith.constant 0 : i32
    return %arg0, %c0_i32 : i32, i32
  }
}

</mosaic_0001>

<bundles_post_ra>
// kernel: tpu_custom_call.1
= control target key start
LH: loop header
LB: loop body
LE: loop exit
PB: predicated region body
PF: predicated region fallthrough
CT: control target
= control target key end

     0   :  { %8 = vsyncpa [#allocation3], 0  ;;  %s300_s0 = inlined_call_operand.hbm [shape: bf16[16,64], index: 0, kind: input, shape index: {}]   ;;  %s301_s1 = inlined_call_operand.hbm [shape: bf16[64,128], index: 1, kind: input, shape index: {}]   ;;  %s302_s2 = inlined_call_operand.vmem [shape: f32[1,128], index: 2, kind: input, shape index: {}]   ;;  %s303_s3 = inlined_call_operand.hbm [shape: f32[16,128], index: 3, kind: output, shape index: {}]  }
   0x1   :  { %9 = vsyncpa [#allocation6], 0 }
   0x2   :  { %10 = vsyncpa [#allocation4], 0  ;;  %s259_s12 = smov [#allocation2]  }
   0x3   :  { %s16_s13 = sshll.u32 %s259_s12, 4  ;;  %s17_s13 = int_to_ptr.vmem [resolvable:$true] %s16_s13 }
   0x4   :  { %s201_s14 = scalar_lea.vmem %s17_s13, 128  ;;  %p206_p1 = scmp.lt.s32.totalorder %s17_s13, %s17_s13 }
   0x5   :  { %p202_p0 = scmp.ne.s32.totalorder %s17_s13, %s201_s14  ;;  %p207_p2 = scmp.lt.s32.totalorder %s201_s14, %s201_s14 }
   0x7   :  { %p208_p3 = por %p207_p2, %p206_p1 }
   0x9   :  { %p209_p4 = pnand %p208_p3, %p202_p0 }
   0xb   :  { %212 = shalt.err (!%p209_p4)
}
   0xc   :  { %s260_s15 = smov 64   ;;  %s261_s16 = smov 4  }
   0xd   :  { %22 = dma.hbm_to_vmem [thread:$0]  %s300_s0, 128, %s17_s13, [#allocation3], %s260_s15, %s260_s15, %s261_s16  }
   0xe   :  { %s262_s19 = smov [#allocation5]  }
   0xf   :  { %s28_s20 = sshll.u32 %s262_s19, 4  ;;  %s29_s20 = int_to_ptr.vmem [resolvable:$true] %s28_s20 }
  0x10   :  { %s221_s21 = scalar_lea.vmem %s29_s20, 512  ;;  %p226_p6 = scmp.lt.s32.totalorder %s29_s20, %s29_s20 }
  0x11   :  { %p222_p5 = scmp.ne.s32.totalorder %s29_s20, %s221_s21  ;;  %p227_p7 = scmp.lt.s32.totalorder %s221_s21, %s221_s21 }
  0x13   :  { %p228_p8 = por %p227_p7, %p226_p6 }
  0x15   :  { %p229_p9 = pnand %p228_p8, %p222_p5 }
  0x17   :  { %232 = shalt.err (!%p229_p9)
}
  0x18   :  { %34 = dma.hbm_to_vmem [thread:$0]  %s301_s1, 512, %s29_s20, [#allocation6], %s260_s15, %s260_s15, %s261_s16  }
  0x19   :  { %253 = dma.done.wait [#allocation3], 128  }
  0x1a   :  { %254 = vsyncadd [#allocation3], 4294967168 }
  0x1b   :  { %255 = dma.done.wait [#allocation6], 512  }
  0x1c   :  { %256 = vsyncadd [#allocation6], 4294966784  ;;  %v263_v0 = vmov 0.0   ;;  %vm264_vm0 = vmmov 0   ;;  %v188_v1 = vld [vmem:[#allocation5 + $0x18] sm:$0xff]   ;;  %v189_v2 = vld [vmem:[#allocation5 + $0x10] sm:$0xff]  }
  0x1d   :  { %167 = vmatprep.subr.bf16.mxu0 %v263_v0  ;;  %175 = vmatprep.mubr.msk.bf16.mxu0 %vm264_vm0, %v263_v0  ;;  %v190_v3 = vld [vmem:[#allocation5 + $0x8] sm:$0xff]   ;;  %v191_v4 = vld [vmem:[#allocation5] sm:$0xff]   ;;  %v192_v5 = vld [vmem:[#allocation2] sm:$0xff]   ;;  %vm90_vm1 = vcmask 523264   ;;  %s265_s24 = smov [#allocation7]  }
  0x1e   :  { %168 = vmatpush3.bf16.msra.mxu0 %v188_v1  ;;  %v155_v6 = vld [vmem:[%s302_s2] ss:$0 sm:$0xff]  ;;  %s142_s25 = sshll.u32 %s265_s24, 4  ;;  %s143_s25 = int_to_ptr.vmem [resolvable:$true] %s142_s25 }
  0x1f   :  { %169 = vmatprep.subr.bf16.mxu0 %v263_v0  ;;  %s233_s26 = scalar_lea.vmem %s143_s25, 256  ;;  %p238_p11 = scmp.lt.s32.totalorder %s143_s25, %s143_s25 }
  0x20   :  { %p234_p10 = scmp.ne.s32.totalorder %s143_s25, %s233_s26  ;;  %p239_p12 = scmp.lt.s32.totalorder %s233_s26, %s233_s26 }
  0x22   :  { %170 = vmatpush3.bf16.msra.mxu0 %v189_v2  ;;  %p240_p13 = por %p239_p12, %p238_p11 }
  0x23   :  { %171 = vmatprep.subr.bf16.mxu0 %v263_v0 }
  0x24   :  { %p241_p0 = pnand %p240_p13, %p234_p10 }
  0x26   :  { %172 = vmatpush3.bf16.msra.mxu0 %v190_v3 }
  0x27   :  { %173 = vmatprep.subr.bf16.mxu0 %v263_v0 }
  0x2a   :  { %174 = vmatpush3.bf16.msra.mxu0 %v191_v4 }
  0x2d   :  { %176 = vmatmul.mubr.msk.bf16.vlgmr.msra.gmra.mxu0 %vm90_vm1, %v192_v5 }
  0xed   :  { %v128_v7 = vpop.f32.mrf.mxu0 }
  0xee   :  { %v129_v8 = vadd.f32 %v155_v6, %v128_v7 }
  0xef   :  { %v177_v9 = vpop.f32.mrf.mxu0 }
  0xf0   :  { %135 = vst [vmem:[#allocation7] sm:$0xff] %v129_v8 }
  0xf1   :  { %v131_v10 = vpop.f32.mrf.mxu0 }
  0xf2   :  { %v132_v11 = vadd.f32 %v155_v6, %v131_v10 }
  0xf3   :  { %v178_v12 = vpop.f32.mrf.mxu0 }
  0xf4   :  { %136 = vst [vmem:[#allocation7 + $0x8] sm:$0xff] %v132_v11 }
  0xf5   :  { %244 = shalt.err (!%p241_p0)
}
  0xf6   :  { %s266_s27 = smov 128   ;;  %s267_s2 = smov 8  }
  0xf7   :  { %148 = dma.vmem_to_hbm [thread:$0]  %s143_s25, 256, %s303_s3, [#allocation4], %s266_s27, %s266_s27, %s267_s2  }
  0xf8   :  { %257 = dma.done.wait [#allocation4], 256  }
  0xf9   :  { %258 = vsyncadd [#allocation4], 4294967040 }
  0xfa   :  { %152 = vsyncpa [#allocation3], 1 }
  0xfb   :  { %153 = vsyncpa [#allocation6], 1 }
  0xfc   :  { %154 = vsyncpa [#allocation4], 1 }

</bundles_post_ra>
